<compile_context>
chip_gen: v5e
topology: v5e:2x2
jax: 0.10.0
libtpu: 0.0.40
codegen_flags: <defaults>
</compile_context>

<pallas_src>
import functools

import jax
import jax.numpy as jnp
from jax.experimental import pallas as pl
from jax.experimental.pallas import tpu as pltpu


def _focus_conv_kernel(xp_ref, w_ref, scale_ref, bias_ref, o_ref,
                       *, KH, KW, TH, Ws, Cin, Coutp):
    # xp_ref   : (1, Hp, Wp, Cin) bf16  -- whole padded image for this batch
    #                                      (block index constant over the row
    #                                       axis -> stays resident in VMEM)
    # w_ref    : (KH*KW*Cin, Coutp) bf16 -- im2col-ordered weights, Cout padded
    # scale_ref: (1, Coutp) f32          -- folded BN scale  = gamma/sqrt(var+eps)
    # bias_ref : (1, Coutp) f32          -- folded BN bias   = beta - mean*scale
    # o_ref    : (1, TH*Ws, Coutp) bf16  -- flat, lane-dense output row tile
    i = pl.program_id(1)
    row0 = pl.multiple_of(i * TH, TH)

    # Build the full im2col patch for this row tile: one concat, one matmul.
    taps = []
    for kh in range(KH):
        rows = xp_ref[0, pl.ds(row0 + kh, TH), :, :]          # (TH, Wp, Cin)
        for kw in range(KW):
            taps.append(rows[:, kw:kw + Ws, :])               # (TH, Ws, Cin)
    patch = jnp.concatenate(taps, axis=-1)                    # (TH, Ws, KH*KW*Cin)
    patch = patch.reshape(TH * Ws, KH * KW * Cin)             # (M, K=576)

    acc = jnp.dot(patch, w_ref[...],
                  preferred_element_type=jnp.float32)         # (M, Coutp) f32

    # Folded BatchNorm + ReLU epilogue on dense (8,128) vregs, f32.
    y = jnp.maximum(acc * scale_ref[...] + bias_ref[...], 0.0)
    o_ref[0] = y.astype(o_ref.dtype)                          # single dense store


def focus_conv_block(x, weight, gamma, beta, running_mean, running_var,
                     *, block_size=4, eps=1e-5):
    """x: (N, C, H, W) f32.  weight: (Cout, C*bs^2, KH, KW) PyTorch OIHW."""
    N, C, H, W = x.shape
    bs = block_size
    Cout, Cin, KH, KW = weight.shape
    assert Cin == C * bs * bs and H % bs == 0 and W % bs == 0
    Hs, Ws = H // bs, W // bs
    ph, pw = KH // 2, KW // 2                                 # get_same_padding
    Hp, Wp = Hs + 2 * ph, Ws + 2 * pw

    # Spatial row tile: whole image for small Hs, otherwise 8-row tiles
    # (keeps the flat output block a multiple of 8 sublanes).
    TH = Hs if (Hs <= 8 or Hs % 8 != 0) else 8
    n_row_tiles = Hs // TH

    # Lane-dense output channel count.
    Coutp = ((Cout + 127) // 128) * 128

    # ---- space-to-depth + NHWC in ONE transpose, SAME pad, bf16 cast ----
    # Channel ordering matches x.view(N,C,Hs,bs,Ws,bs).permute(0,3,5,1,2,4):
    # c' = (bh*bs + bw)*C + c.
    xf = x.reshape(N, C, Hs, bs, Ws, bs).transpose(0, 2, 4, 3, 5, 1)
    xf = xf.reshape(N, Hs, Ws, Cin)
    xp = jnp.pad(xf, ((0, 0), (ph, ph), (pw, pw), (0, 0))).astype(jnp.bfloat16)

    # ---- weights: OIHW -> im2col (KH*KW*Cin, Cout) -> pad Cout -> bf16 ----
    w_mat = weight.transpose(2, 3, 1, 0).reshape(KH * KW * Cin, Cout)
    w_mat = jnp.pad(w_mat, ((0, 0), (0, Coutp - Cout))).astype(jnp.bfloat16)

    # ---- fold BatchNorm (eval mode) into per-channel scale/bias (f32) ----
    inv_std = 1.0 / jnp.sqrt(running_var + eps)
    scale = jnp.pad(gamma * inv_std, (0, Coutp - Cout))
    bias = jnp.pad(beta - running_mean * gamma * inv_std, (0, Coutp - Cout))
    scale = scale.reshape(1, Coutp).astype(jnp.float32)
    bias = bias.reshape(1, Coutp).astype(jnp.float32)

    kernel = functools.partial(_focus_conv_kernel, KH=KH, KW=KW, TH=TH,
                               Ws=Ws, Cin=Cin, Coutp=Coutp)

    flops = 2 * N * Hs * Ws * KH * KW * Cin * Cout
    bytes_accessed = (xp.size * 2 + w_mat.size * 2
                      + N * Hs * Ws * Coutp * 2 + 2 * Coutp * 4)

    out_flat = pl.pallas_call(
        kernel,
        out_shape=jax.ShapeDtypeStruct((N, Hs * Ws, Coutp), jnp.bfloat16),
        grid_spec=pltpu.PrefetchScalarGridSpec(
            num_scalar_prefetch=0,
            grid=(N, n_row_tiles),
            in_specs=[
                # Padded image: constant block index over the row axis
                # -> DMA'd once per batch, resident while row tiles run.
                pl.BlockSpec((1, Hp, Wp, Cin), lambda n, i: (n, 0, 0, 0)),
                # Weights / BN params: constant over the whole grid.
                pl.BlockSpec((KH * KW * Cin, Coutp), lambda n, i: (0, 0)),
                pl.BlockSpec((1, Coutp), lambda n, i: (0, 0)),
                pl.BlockSpec((1, Coutp), lambda n, i: (0, 0)),
            ],
            out_specs=pl.BlockSpec((1, TH * Ws, Coutp), lambda n, i: (n, i, 0)),
        ),
        compiler_params=pltpu.CompilerParams(
            dimension_semantics=("parallel", "parallel")),
        cost_estimate=pl.CostEstimate(flops=flops, transcendentals=0,
                                      bytes_accessed=bytes_accessed),
    )(xp, w_mat, scale, bias)

    # ---- drop padded channels, back to NCHW f32 (module's return layout) ----
    out = out_flat[:, :, :Cout].reshape(N, Hs, Ws, Cout)
    return out.transpose(0, 3, 1, 2).astype(x.dtype)


def _reference(x, weight, gamma, beta, running_mean, running_var,
               *, block_size=4, eps=1e-5):
    """Pure-JAX reference of the PyTorch forward (eval-mode BN).

    Inputs are rounded to bf16 (like the kernel's operands) so the comparison
    isolates real bugs rather than bf16 quantization of the data itself.
    """
    N, C, H, W = x.shape
    bs = block_size
    Hs, Ws = H // bs, W // bs
    xs = x.reshape(N, C, Hs, bs, Ws, bs).transpose(0, 3, 5, 1, 2, 4)
    xs = xs.reshape(N, C * bs * bs, Hs, Ws)
    xs = xs.astype(jnp.bfloat16).astype(jnp.float32)
    w = weight.astype(jnp.bfloat16).astype(jnp.float32)
    y = jax.lax.conv_general_dilated(
        xs, w, window_strides=(1, 1), padding="SAME",
        dimension_numbers=("NCHW", "OIHW", "NCHW"))
    inv_std = 1.0 / jnp.sqrt(running_var + eps)
    y = (y - running_mean[None, :, None, None]) * inv_std[None, :, None, None]
    y = y * gamma[None, :, None, None] + beta[None, :, None, None]
    return jnp.maximum(y, 0.0)


if __name__ == "__main__":
    # Module config: in_channel=4, out_channel=32, kernel_size=3, block_size=4,
    # use_bn=True, act_func='relu', shortcut=False, bias=False.
    N, C, H, W = 2, 4, 16, 16
    bs, Cout, K = 4, 32, 3
    Cin = C * bs * bs

    key = jax.random.PRNGKey(0)
    kx, kw, kg, kb, km, kv = jax.random.split(key, 6)

    x = jax.random.normal(kx, (N, C, H, W), dtype=jnp.float32)
    weight = 0.05 * jax.random.normal(kw, (Cout, Cin, K, K), dtype=jnp.float32)
    # BatchNorm parameters / running statistics (deterministic synthetic init).
    gamma = 1.0 + 0.1 * jax.random.normal(kg, (Cout,), dtype=jnp.float32)
    beta = 0.1 * jax.random.normal(kb, (Cout,), dtype=jnp.float32)
    running_mean = 0.1 * jax.random.normal(km, (Cout,), dtype=jnp.float32)
    running_var = 0.5 + jnp.abs(jax.random.normal(kv, (Cout,), dtype=jnp.float32))

    out = focus_conv_block(x, weight, gamma, beta, running_mean, running_var,
                           block_size=bs)
    out = jax.block_until_ready(out)

    ref = _reference(x, weight, gamma, beta, running_mean, running_var,
                     block_size=bs)
    assert out.shape == (N, Cout, H // bs, W // bs)
    err = jnp.max(jnp.abs(out - ref))
    # Tolerance covers the bf16 output store (<= 1 bf16 ulp) + accumulation
    # order differences; any tap/BN-fold bug would exceed this by orders.
    assert jnp.allclose(out, ref, atol=1e-2, rtol=1e-2), f"max abs err {err}"

    print("KERNEL_OK")
</pallas_src>

<mosaic_0001>
module attributes {stable_mosaic.version = 11 : i64} {
  func.func @_focus_conv_kernel(%arg0: i32, %arg1: i32, %arg2: memref<1x6x6x64xbf16, #tpu.memory_space<vmem>>, %arg3: memref<576x128xbf16, #tpu.memory_space<vmem>>, %arg4: memref<1x128xf32, #tpu.memory_space<vmem>>, %arg5: memref<1x128xf32, #tpu.memory_space<vmem>>, %arg6: memref<1x16x128xbf16, #tpu.memory_space<vmem>>) attributes {dimension_semantics = [#tpu.dimension_semantics<parallel>, #tpu.dimension_semantics<parallel>], iteration_bounds = array<i64: 2, 1>, scalar_prefetch = 0 : i64, scratch_operands = 0 : i64, tpu.core_type = #tpu.core_type<tc>, window_params = [{transform_indices = @transform_0, window_bounds = array<i64: 1, 6, 6, 64>}, {pipeline_mode = #tpu.pipeline_mode<synchronous>, transform_indices = @transform_1, window_bounds = array<i64: 576, 128>}, {pipeline_mode = #tpu.pipeline_mode<synchronous>, transform_indices = @transform_2, window_bounds = array<i64: 1, 128>}, {pipeline_mode = #tpu.pipeline_mode<synchronous>, transform_indices = @transform_3, window_bounds = array<i64: 1, 128>}, {transform_indices = @transform_4, window_bounds = array<i64: 1, 16, 128>}]} {
    %c4_i32 = arith.constant 4 : i32
    %0 = arith.muli %arg1, %c4_i32 : i32
    %1 = tpu.assume_multiple %0, 4 : i32
    %c0_i32 = arith.constant 0 : i32
    %2 = arith.addi %1, %c0_i32 : i32
    %c0 = arith.constant 0 : index
    %3 = arith.index_cast %2 : i32 to index
    %c0_0 = arith.constant 0 : index
    %c0_1 = arith.constant 0 : index
    %4 = vector.load %arg2[%c0, %3, %c0_0, %c0_1] : memref<1x6x6x64xbf16, #tpu.memory_space<vmem>>, vector<1x4x6x64xbf16>
    %5 = vector.shape_cast %4 : vector<1x4x6x64xbf16> to vector<4x6x64xbf16>
    %6 = vector.extract_strided_slice %5 {offsets = [0, 0, 0], sizes = [4, 4, 64], strides = [1, 1, 1]} : vector<4x6x64xbf16> to vector<4x4x64xbf16>
    %7 = vector.extract_strided_slice %5 {offsets = [0, 1, 0], sizes = [4, 4, 64], strides = [1, 1, 1]} : vector<4x6x64xbf16> to vector<4x4x64xbf16>
    %8 = vector.extract_strided_slice %5 {offsets = [0, 2, 0], sizes = [4, 4, 64], strides = [1, 1, 1]} : vector<4x6x64xbf16> to vector<4x4x64xbf16>
    %c1_i32 = arith.constant 1 : i32
    %9 = arith.addi %1, %c1_i32 : i32
    %c0_2 = arith.constant 0 : index
    %10 = arith.index_cast %9 : i32 to index
    %c0_3 = arith.constant 0 : index
    %c0_4 = arith.constant 0 : index
    %11 = vector.load %arg2[%c0_2, %10, %c0_3, %c0_4] : memref<1x6x6x64xbf16, #tpu.memory_space<vmem>>, vector<1x4x6x64xbf16>
    %12 = vector.shape_cast %11 : vector<1x4x6x64xbf16> to vector<4x6x64xbf16>
    %13 = vector.extract_strided_slice %12 {offsets = [0, 0, 0], sizes = [4, 4, 64], strides = [1, 1, 1]} : vector<4x6x64xbf16> to vector<4x4x64xbf16>
    %14 = vector.extract_strided_slice %12 {offsets = [0, 1, 0], sizes = [4, 4, 64], strides = [1, 1, 1]} : vector<4x6x64xbf16> to vector<4x4x64xbf16>
    %15 = vector.extract_strided_slice %12 {offsets = [0, 2, 0], sizes = [4, 4, 64], strides = [1, 1, 1]} : vector<4x6x64xbf16> to vector<4x4x64xbf16>
    %c2_i32 = arith.constant 2 : i32
    %16 = arith.addi %1, %c2_i32 : i32
    %c0_5 = arith.constant 0 : index
    %17 = arith.index_cast %16 : i32 to index
    %c0_6 = arith.constant 0 : index
    %c0_7 = arith.constant 0 : index
    %18 = vector.load %arg2[%c0_5, %17, %c0_6, %c0_7] : memref<1x6x6x64xbf16, #tpu.memory_space<vmem>>, vector<1x4x6x64xbf16>
    %19 = vector.shape_cast %18 : vector<1x4x6x64xbf16> to vector<4x6x64xbf16>
    %20 = vector.extract_strided_slice %19 {offsets = [0, 0, 0], sizes = [4, 4, 64], strides = [1, 1, 1]} : vector<4x6x64xbf16> to vector<4x4x64xbf16>
    %21 = vector.extract_strided_slice %19 {offsets = [0, 1, 0], sizes = [4, 4, 64], strides = [1, 1, 1]} : vector<4x6x64xbf16> to vector<4x4x64xbf16>
    %22 = vector.extract_strided_slice %19 {offsets = [0, 2, 0], sizes = [4, 4, 64], strides = [1, 1, 1]} : vector<4x6x64xbf16> to vector<4x4x64xbf16>
    %23 = tpu.concatenate %6, %7, %8, %13, %14, %15, %20, %21, %22 in 2 : vector<4x4x64xbf16>, vector<4x4x64xbf16>, vector<4x4x64xbf16>, vector<4x4x64xbf16>, vector<4x4x64xbf16>, vector<4x4x64xbf16>, vector<4x4x64xbf16>, vector<4x4x64xbf16>, vector<4x4x64xbf16> -> vector<4x4x576xbf16>
    %24 = vector.shape_cast %23 : vector<4x4x576xbf16> to vector<16x576xbf16>
    %c0_8 = arith.constant 0 : index
    %c0_9 = arith.constant 0 : index
    %25 = vector.load %arg3[%c0_8, %c0_9] : memref<576x128xbf16, #tpu.memory_space<vmem>>, vector<576x128xbf16>
    %cst = arith.constant dense<0.000000e+00> : vector<16x128xf32>
    %26 = tpu.matmul %24, %25, %cst {dimension_numbers = #tpu.dot_dimension_numbers<[1], [0], [0], [1], [0, 0, 1, 1], [], []>} : vector<16x576xbf16>, vector<576x128xbf16>, vector<16x128xf32> -> vector<16x128xf32>
    %c0_10 = arith.constant 0 : index
    %c0_11 = arith.constant 0 : index
    %27 = vector.load %arg4[%c0_10, %c0_11] : memref<1x128xf32, #tpu.memory_space<vmem>>, vector<1x128xf32>
    %28 = vector.broadcast %27 : vector<1x128xf32> to vector<16x128xf32>
    %29 = arith.mulf %26, %28 : vector<16x128xf32>
    %c0_12 = arith.constant 0 : index
    %c0_13 = arith.constant 0 : index
    %30 = vector.load %arg5[%c0_12, %c0_13] : memref<1x128xf32, #tpu.memory_space<vmem>>, vector<1x128xf32>
    %31 = vector.broadcast %30 : vector<1x128xf32> to vector<16x128xf32>
    %32 = arith.addf %29, %31 : vector<16x128xf32>
    %cst_14 = arith.constant 0.000000e+00 : f32
    %33 = vector.broadcast %cst_14 : f32 to vector<16x128xf32>
    %34 = arith.maximumf %32, %33 : vector<16x128xf32>
    %35 = arith.truncf %34 : vector<16x128xf32> to vector<16x128xbf16>
    %c0_15 = arith.constant 0 : index
    %c0_16 = arith.constant 0 : index
    %c0_17 = arith.constant 0 : index
    %36 = vector.load %arg6[%c0_15, %c0_16, %c0_17] : memref<1x16x128xbf16, #tpu.memory_space<vmem>>, vector<1x16x128xbf16>
    %37 = vector.shape_cast %36 : vector<1x16x128xbf16> to vector<16x128xbf16>
    %38 = vector.shape_cast %35 : vector<16x128xbf16> to vector<1x16x128xbf16>
    tpu.vector_store %arg6[%c0_15, %c0_16, %c0_17], %38 {strides = array<i32>} : memref<1x16x128xbf16, #tpu.memory_space<vmem>>, vector<1x16x128xbf16>,
    return
  }
  func.func @transform_0(%arg0: i32, %arg1: i32) -> (i32, i32, i32, i32) {
    %c0_i32 = arith.constant 0 : i32
    %c0_i32_0 = arith.constant 0 : i32
    %c0_i32_1 = arith.constant 0 : i32
    %c0_i32_2 = arith.constant 0 : i32
    return %arg0, %c0_i32, %c0_i32_0, %c0_i32_1 : i32, i32, i32, i32
  }
  func.func @transform_1(%arg0: i32, %arg1: i32) -> (i32, i32) {
    %c0_i32 = arith.constant 0 : i32
    %c0_i32_0 = arith.constant 0 : i32
    %c0_i32_1 = arith.constant 0 : i32
    return %c0_i32, %c0_i32_0 : i32, i32
  }
  func.func @transform_2(%arg0: i32, %arg1: i32) -> (i32, i32) {
    %c0_i32 = arith.constant 0 : i32
    %c0_i32_0 = arith.constant 0 : i32
    %c0_i32_1 = arith.constant 0 : i32
    return %c0_i32, %c0_i32_0 : i32, i32
  }
  func.func @transform_3(%arg0: i32, %arg1: i32) -> (i32, i32) {
    %c0_i32 = arith.constant 0 : i32
    %c0_i32_0 = arith.constant 0 : i32
    %c0_i32_1 = arith.constant 0 : i32
    return %c0_i32, %c0_i32_0 : i32, i32
  }
  func.func @transform_4(%arg0: i32, %arg1: i32) -> (i32, i32, i32) {
    %c0_i32 = arith.constant 0 : i32
    %c0_i32_0 = arith.constant 0 : i32
    return %arg0, %arg1, %c0_i32 : i32, i32, i32
  }
}

</mosaic_0001>

<bundles_post_ra>
// kernel: tpu_custom_call.1
= control target key start
LH: loop header
LB: loop body
LE: loop exit
PB: predicated region body
PF: predicated region fallthrough
CT: control target
= control target key end

     0   :  { %9 = vsyncpa [#allocation3], 0  ;;  %s1726_s0 = inlined_call_operand.vmem [shape: bf16[2,6,6,64], index: 0, kind: input, shape index: {}]   ;;  %s1727_s1 = inlined_call_operand.hbm [shape: bf16[576,128], index: 1, kind: input, shape index: {}]   ;;  %s1728_s2 = inlined_call_operand.vmem [shape: f32[1,128], index: 2, kind: input, shape index: {}]   ;;  %s1729_s3 = inlined_call_operand.vmem [shape: f32[1,128], index: 3, kind: input, shape index: {}]   ;;  %s1730_s4 = inlined_call_operand.hbm [shape: bf16[2,16,128], index: 4, kind: output, shape index: {}]  }
   0x1   :  { %10 = vsyncpa [#allocation4], 0 }
   0x2   :  { %12 = vsyncpa [#allocation4 + $0x1], 0  ;;  %s1459_s15 = smov 0   ;;  %s1461_s16 = smov 0  }
   0x3   :  { %s1463_s17 = smov 0   ;;  %s1465_s18 = smov 0  }
   0x4   :  { %s1467_s19 = smov 0   ;;  %s1469_s20 = smov 0  }
   0x5 LB: > { %s1033_s21 = sadd.s32 4294967295, %s1427_s20   ;;  %s1034_s22 = sadd.s32 4294967294, %s1427_s20   ;;  %s1427_s20 = sphi %s1469_s20, %s18_s20   ;;  %s1423_s19 = sphi %s1467_s19, %s1737_s19   ;;  %s1419_s18 = sphi %s1465_s18, %s1736_s18   ;;  %s1415_s17 = sphi %s1463_s17, %s1735_s17   ;;  %s1411_s16 = sphi %s1461_s16, %s1734_s16   ;;  %s1407_s15 = sphi %s1459_s15, %s1733_s15  }
   0x6   : > { %s30_s23 = sadd.s32 1, %s1423_s19  ;;  %s128_s24 = sadd.s32 1, %s1415_s17 }
   0x7   : > { %p32_p0 = scmp.ge.s32.totalorder %s30_s23, 2  ;;  %p138_p1 = scmp.ne.s32.totalorder %s1415_s17, %s1411_s16 }
   0x8   : > { %p139_p2 = scmp.eq.s32.totalorder %s1033_s21, 1  ;;  %p144_p3 = scmp.ne.s32.totalorder %s1411_s16, %s1407_s15 }
   0x9   : > { %s1739_s23 = smov (%p32_p0, %s30_s23), 0  ;;  %p145_p5 = scmp.eq.s32.totalorder %s1034_s22, 1 }
   0xa   : > { %p1499_p4 = por %p139_p2, %p138_p1  ;;  %s123_s26 = ssub.s32 %s1423_s19, %s1739_s23 }
   0xb   : > { %p1035_p6 = scmp.ge.s32.totalorder %s1427_s20, 1  ;;  %p126_p7 = scmp.eq.s32.totalorder %s123_s26, 0 }
   0xc   : > { %p1506_p8 = por %p145_p5, %p144_p3  ;;  %p152_p9 = scmp.lt.s32.totalorder %s1427_s20, 3 }
   0xd   : > { %s1512_s28 = scalar_select %p126_p7, %s1415_s17, %s128_s24  }
   0xe   : > { %p153_p10 = pnand %p1035_p6, %p152_p9  ;;  %p1257_p11 = scmp.eq.s32.totalorder %s1033_s21, 0 }
   0xf   : > { %s163_s5 = sshll.u32 %s1727_s1, 4  ;;  %s1429_s6 = smov [#allocation2]   ;;  %s164_s5 = int_to_ptr.hbm [resolvable:$true] %s163_s5 }
  0x10   : > { %p1249_p12 = pneg %p153_p10  ;;  %s165_s7 = sshll.u32 %s1429_s6, 4  ;;  %s166_s7 = int_to_ptr.vmem [resolvable:$true] %s165_s7 }
  0x11   : > { %s1430_s8 = smov 64   ;;  %s1431_s9 = smov 4  }
  0x12   : > { %p1250_p13 = pnand %p1257_p11, %p1249_p12  ;;  %195 = sbr.rel (%p153_p10) target bundleno = 366 (0x16e), region = 36 }
  0x14   : > { %1252 = dma.hbm_to_vmem [thread:$0]  (!%p1250_p13), %s164_s5, 4608, %s166_s7, [#allocation3], %s1430_s8, %s1430_s8, %s1431_s9  }
  0x17   : > { %1398 = dma.done.wait (%p1257_p11), [#allocation3], 4608  }
  0x18   : > { %1400 = vsyncadd (%p1257_p11), [#allocation3], 4294962688  ;;  %p222_p0 = scmp.lt.s32.totalorder %s1419_s18, 1  ;;  %s1432_s21 = smov 64   ;;  %vm414_vm0 = vcmask 523264   ;;  %vm490_vm1 = vcmask 1045508  }
  0x19   : > { %vm487_vm2 = vcmask 1041408   ;;  %vm494_vm3 = vcmask 1043456   ;;  %s219_s26 = sand.u32 1, %s1411_s16   ;;  %s1236_s6 = sshll.u32 %s1419_s18, 3 }
  0x1a   : > { %s223_s10 = scalar_select %p222_p0, %s1419_s18, 1 }
  0x1b   : > { %s1040_s5 = sshll.u32 %s219_s26, 3  ;;  %s934_s9 = scalar_lea.hbm %s1730_s4, %s1236_s6 }
  0x1c   : > { %s1242_s11 = smul.u32 24, %s223_s10  ;;  %s221_s10 = scalar_lea.vmem [#allocation5], %s1040_s5 }
  0x1d   : > { %s937_s12 = sshll.u32 %s934_s9, 4  ;;  %s921_s13 = scalar_lea.sflag [#allocation4], %s219_s26  ;;  %s938_s12 = int_to_ptr.hbm [resolvable:$true] %s937_s12 }
  0x1e   : > { %s1522_s14 = scalar_lea.vmem %s1726_s0, %s1242_s11  ;;  %s935_s11 = sshll.u32 %s221_s10, 4  ;;  %s936_s11 = int_to_ptr.vmem [resolvable:$true] %s935_s11 }
  0x1f   : > { %v1044_v0 = vld [vmem:[%s1522_s14 + $0xc] sm:$0x7]  ;;  %v1042_v1 = vld [vmem:[%s1522_s14 + $0x4] sm:$0x7]  ;;  %v1043_v4 = vld [vmem:[%s1522_s14 + $0x8] sm:$0x7] }
  0x20   : > { %v308_v2 = vunpack.c.l.b16 %v1044_v0  ;;  %v306_v3 = vunpack.c.l.b16 %v1042_v1  ;;  %v1528_v5 = vld [vmem:[%s1522_s14 + $0x8] sm:$0x7]  ;;  %v1531_v6 = vld [vmem:[%s1522_s14 + $0x10] sm:$0x7]  ;;  %v1537_v10 = vld [vmem:[%s1522_s14 + $0xc] sm:$0x7]  ;;  %v307_v14 = vunpack.c.l.b16 %v1043_v4 }
  0x21   : > { %v1045_v7 = vld [vmem:[%s1522_s14 + $0x10] sm:$0x7]  ;;  %v366_v8 = vunpack.c.l.b16 %v1528_v5  ;;  %v368_v9 = vunpack.c.l.b16 %v1531_v6  ;;  %v1540_v11 = vld [vmem:[%s1522_s14 + $0x14] sm:$0x7]  ;;  %v367_v15 = vunpack.c.l.b16 %v1537_v10  ;;  %v1564_v31 = vld [vmem:[%s1522_s14 + $0x4] sm:$0x7] }
  0x22   : > { %v1542_v12 = vpack.c.b16 %v308_v2, %v308_v2  ;;  %v1544_v13 = vpack.c.b16 %v306_v3, %v306_v3  ;;  %v309_v18 = vunpack.c.l.b16 %v1045_v7  ;;  %v369_v20 = vunpack.c.l.b16 %v1540_v11  ;;  %v1567_v32 = vld [vmem:[%s1522_s14] sm:$0x7]  ;;  %v1572_v37 = vld [vmem:[%s1522_s14 + $0x8] sm:$0x7]  ;;  %v1585_v51 = vld [vmem:[%s1522_s14 + $0xc] sm:$0x7] }
  0x23   : > { %v370_v16 = vpack.c.b16 %v366_v8, %v366_v8  ;;  %v372_v19 = vpack.c.b16 %v368_v9, %v368_v9  ;;  %v371_v22 = vpack.c.b16 %v367_v15, %v367_v15  ;;  %v1554_v23 = vpack.c.b16 %v307_v14, %v307_v14  ;;  %s1359_s18 = sshra.s32 %s938_s12, 4  ;;  %s1365_s29 = scalar_lea.hbm %s1730_s4, 16  ;;  %s1360_s18 = int_to_ptr.hbm [resolvable:$true] %s1359_s18 }
  0x24   : > { %318 = vrot.lane.b32.xlu1 %v1542_v12, %s1432_s21  ;;  %314 = vrot.lane.b32.xlu0 %v1544_v13, %s1432_s21  ;;  %v350_v17 = vrot.slane %v1544_v13, 1  ;;  %v1556_v26 = vpack.c.b16 %v309_v18, %v309_v18  ;;  %v373_v27 = vpack.c.b16 %v369_v20, %v369_v20  ;;  %v352_v38 = vrot.slane %v1542_v12, 1  ;;  %v1215_v20 = vld [vmem:[#allocation2 + $0x78] sm:$0xff]  ;;  %s1361_s14 = scalar_lea.hbm %s1360_s18, 8  ;;  %p1366_p5 = scmp.lt.s32.totalorder %s1360_s18, %s1730_s4 }
  0x25   : > { %v410_v21 = vrot.slane %v370_v16, 1  ;;  %v412_v24 = vrot.slane %v372_v19, 1  ;;  %v411_v25 = vrot.slane %v371_v22, 1  ;;  %v351_v28 = vrot.slane %v1554_v23, 1  ;;  %846 = vmatpush.bf16.msra.mxu1 %v1215_v20  ;;  %p1362_p1 = scmp.ne.s32.totalorder %s1360_s18, %s1361_s14  ;;  %p1367_p6 = scmp.lt.s32.totalorder %s1365_s29, %s1361_s14 }
  0x26   : > { %354 = vrot.lane.b32.xlu2 %v350_v17, %s1432_s21  ;;  %v377_v29 = vshll.u32 %v370_v16, 16  ;;  %v413_v30 = vrot.slane %v373_v27, 1  ;;  %v375_v33 = vshrl.u32 %v370_v16, 16  ;;  %v353_v35 = vrot.slane %v1556_v26, 1 }
  0x27   : > { %595 = vst [vmem:[#allocation1 + $0x20] ss:$4 sm:$0xff] %v410_v21  ;;  %v391_v36 = vshll.u32 %v372_v19, 16  ;;  %v384_v39 = vshll.u32 %v371_v22, 16  ;;  %v255_v40 = vunpack.c.l.b16 %v1564_v31  ;;  %v254_v41 = vunpack.c.l.b16 %v1567_v32  ;;  %v1223_v21 = vld [vmem:[#allocation2 + $0xb8] sm:$0xff]  ;;  %p1363_p2 = pnand %p1362_p1, %p1499_p4  ;;  %p1368_p7 = por %p1367_p6, %p1366_p5 }
  0x28   : > { %601 = vst [vmem:[#allocation1 + $0x22] ss:$4 sm:$0xff] %v412_v24  ;;  %v379_v34 = vrot.slane %v377_v29, 1  ;;  %v398_v43 = vshll.u32 %v373_v27, 16  ;;  %v256_v44 = vunpack.c.l.b16 %v1572_v37  ;;  %v389_v45 = vshrl.u32 %v372_v19, 16  ;;  %v1207_v19 = vld [vmem:[#allocation2 + $0x38] sm:$0xff]  ;;  %860 = vmatpush.bf16.msra.mxu2 %v1223_v21 }
  0x29   : > { %598 = vst [vmem:[#allocation1 + $0x21] ss:$4 sm:$0xff] %v411_v25  ;;  %v393_v46 = vrot.slane %v391_v36, 1  ;;  %v382_v47 = vshrl.u32 %v371_v22, 16  ;;  %v386_v48 = vrot.slane %v384_v39, 1  ;;  %v1580_v49 = vpack.c.b16 %v255_v40, %v255_v40  ;;  %v1231_v22 = vld [vmem:[#allocation2 + $0xf8] sm:$0xff]  ;;  %832 = vmatpush.bf16.msra.mxu0 %v1207_v19  ;;  %p1364_p3 = pneg %p1363_p2 }
  0x2a   : > { %604 = vst [vmem:[#allocation1 + $0x23] ss:$4 sm:$0xff] %v413_v30  ;;  %v380_v42 = vor.u32 %v379_v34, %v375_v33  ;;  %v1582_v50 = vpack.c.b16 %v254_v41, %v254_v41  ;;  %v396_v52 = vshrl.u32 %v373_v27, 16  ;;  %v400_v53 = vrot.slane %v398_v43, 1  ;;  %874 = vmatpush.bf16.msra.mxu3 %v1231_v22  ;;  %v1206_v24 = vld [vmem:[#allocation2 + $0x30] sm:$0xff]  ;;  %v1205_v30 = vld [vmem:[#allocation2 + $0x28] sm:$0xff] }
  0x2b   : > { %v1588_v54 = vpack.c.b16 %v256_v44, %v256_v44  ;;  %v394_v55 = vor.u32 %v393_v46, %v389_v45  ;;  %v387_v56 = vor.u32 %v386_v48, %v382_v47  ;;  %v272_v57 = vshll.u32 %v1580_v49, 16  ;;  %v1214_v25 = vld [vmem:[#allocation2 + $0x70] sm:$0xff]  ;;  %v1213_v33 = vld [vmem:[#allocation2 + $0x68] sm:$0xff]  ;;  %v1204_v39 = vld [vmem:[#allocation2 + $0x20] sm:$0xff]  ;;  %p1369_p9 = pnand %p1368_p7, %p1364_p3 }
  0x2c   : > { %320 = vrot.lane.b32.xlu1 %v1556_v26, %s1432_s21  ;;  %316 = vrot.lane.b32.xlu0 %v1554_v23, %s1432_s21  ;;  %v265_v58 = vshll.u32 %v1582_v50, 16  ;;  %v257_v59 = vunpack.c.l.b16 %v1585_v51  ;;  %v401_v60 = vor.u32 %v400_v53, %v396_v52  ;;  %v270_v62 = vshrl.u32 %v1580_v49, 16  ;;  %v1222_v27 = vld [vmem:[#allocation2 + $0xb0] sm:$0xff]  ;;  %v1221_v34 = vld [vmem:[#allocation2 + $0xa8] sm:$0xff]  ;;  %v1212_v40 = vld [vmem:[#allocation2 + $0x60] sm:$0xff] }
  0x2d   : > { %v279_v61 = vshll.u32 %v1588_v54, 16  ;;  %v274_v63 = vrot.slane %v272_v57, 1  ;;  %v263_v0 = vshrl.u32 %v1582_v50, 16  ;;  %v277_v3 = vshrl.u32 %v1588_v54, 16  ;;  %v1230_v29 = vld [vmem:[#allocation2 + $0xf0] sm:$0xff]  ;;  %833 = vmatpush.bf16.msra.mxu0 %v1206_v24  ;;  %847 = vmatpush.bf16.msra.mxu1 %v1214_v25  ;;  %v1220_v41 = vld [vmem:[#allocation2 + $0xa0] sm:$0xff] }
  0x2e   : > { %356 = vrot.lane.b32.xlu2 %v351_v28, %s1432_s21  ;;  %v267_v1 = vrot.slane %v265_v58, 1  ;;  %v1598_v2 = vpack.c.b16 %v257_v59, %v257_v59  ;;  %861 = vmatpush.bf16.msra.mxu2 %v1222_v27  ;;  %v1203_v44 = vld [vmem:[#allocation2 + $0x18] sm:$0xff]  ;;  %v1202_v53 = vld [vmem:[#allocation2 + $0x10] sm:$0xff]  ;;  %v339_v58 = vshll.u32 %v1542_v12, 16  ;;  %v323_v19 = vshrl.u32 %v1544_v13, 16 }
  0x2f   : > { %v281_v4 = vrot.slane %v279_v61, 1  ;;  %v275_v7 = vor.u32 %v274_v63, %v270_v62  ;;  %875 = vmatpush.bf16.msra.mxu3 %v1230_v29  ;;  %v1211_v45 = vld [vmem:[#allocation2 + $0x58] sm:$0xff]  ;;  %v1226_v57 = vld [vmem:[#allocation2 + $0xd0] sm:$0xff]  ;;  %v1209_v61 = vld [vmem:[#allocation2 + $0x48] sm:$0xff] }
  0x30   : > { %v268_v8 = vor.u32 %v267_v1, %v263_v0  ;;  %v286_v9 = vshll.u32 %v1598_v2, 16  ;;  %v284_v15 = vshrl.u32 %v1598_v2, 16  ;;  %v1219_v46 = vld [vmem:[#allocation2 + $0x98] sm:$0xff]  ;;  %v1217_v62 = vld [vmem:[#allocation2 + $0x88] sm:$0xff]  ;;  %v325_v0 = vshll.u32 %v1544_v13, 16  ;;  %v1200_v1 = vld [vmem:[#allocation2] sm:$0xff] }
  0x31   : > { %v282_v14 = vor.u32 %v281_v4, %v277_v3  ;;  %834 = vmatpush.bf16.msra.mxu0 %v1205_v30  ;;  %848 = vmatpush.bf16.msra.mxu1 %v1213_v33  ;;  %v1227_v47 = vld [vmem:[#allocation2 + $0xd8] sm:$0xff]  ;;  %v1225_v63 = vld [vmem:[#allocation2 + $0xc8] sm:$0xff]  ;;  %v1208_v3 = vld [vmem:[#allocation2 + $0x40] sm:$0xff]  ;;  %v337_v4 = vshrl.u32 %v1542_v12, 16  ;;  %v330_v12 = vshrl.u32 %v1554_v23, 16 }
  0x32   : > { %v288_v16 = vrot.slane %v286_v9, 1  ;;  %862 = vmatpush.bf16.msra.mxu2 %v1221_v34  ;;  %v1224_v9 = vld [vmem:[#allocation2 + $0xc0] sm:$0xff]  ;;  %v327_v20 = vrot.slane %v325_v0, 1  ;;  %v1235_v24 = vld [vmem:[#allocation2 + $0x118] sm:$0xff]  ;;  %v1234_v30 = vld [vmem:[#allocation2 + $0x110] sm:$0xff]  ;;  %v301_v0 = vrot.slane %v1598_v2, 1 }
  0x34   : > { %360 = vrot.lane.b32.xlu1 %v353_v35, %s1432_s21  ;;  %358 = vrot.lane.b32.xlu0 %v352_v38, %s1432_s21  ;;  %v289_v17 = vor.u32 %v288_v16, %v284_v15  ;;  %v1229_v35 = vld [vmem:[#allocation2 + $0xe8] sm:$0xff]  ;;  %v328_v27 = vor.u32 %v327_v20, %v323_v19 }
  0x35   : > { %876 = vmatpush.bf16.msra.mxu3 %v1229_v35  ;;  %835 = vmatpush.bf16.msra.mxu0 %v1204_v39  ;;  %v298_v35 = vrot.slane %v1582_v50, 1 }
  0x36   : > { %402 = vrot.lane.b32.xlu2 %v380_v42, %s1432_s21  ;;  %v1228_v42 = vld [vmem:[#allocation2 + $0xe0] sm:$0xff]  ;;  %849 = vmatpush.bf16.msra.mxu1 %v1212_v40 }
  0x37   : > { %863 = vmatpush.bf16.msra.mxu2 %v1220_v41 }
  0x39   : > { %877 = vmatpush.bf16.msra.mxu3 %v1228_v42  ;;  %836 = vmatpush.bf16.msra.mxu0 %v1203_v44 }
  0x3a   : > { %850 = vmatpush.bf16.msra.mxu1 %v1211_v45 }
  0x3b   : > { %864 = vmatpush.bf16.msra.mxu2 %v1219_v46  ;;  %v1233_v46 = vld [vmem:[#allocation2 + $0x108] sm:$0xff] }
  0x3c   : > { %406 = vrot.lane.b32.xlu1 %v394_v55, %s1432_s21  ;;  %404 = vrot.lane.b32.xlu0 %v387_v56, %s1432_s21  ;;  %v1210_v55 = vld [vmem:[#allocation2 + $0x50] sm:$0xff] }
  0x3d   : > { %878 = vmatpush.bf16.msra.mxu3 %v1227_v47  ;;  %v1218_v56 = vld [vmem:[#allocation2 + $0x90] sm:$0xff]  ;;  %837 = vmatpush.bf16.msra.mxu0 %v1202_v53 }
  0x3e   : > { %408 = vrot.lane.b32.xlu2 %v401_v60, %s1432_s21  ;;  %851 = vmatpush.bf16.msra.mxu1 %v1210_v55  ;;  %v1201_v60 = vld [vmem:[#allocation2 + $0x8] sm:$0xff] }
  0x3f   : > { %865 = vmatpush.bf16.msra.mxu2 %v1218_v56 }
  0x41   : > { %879 = vmatpush.bf16.msra.mxu3 %v1226_v57  ;;  %838 = vmatpush.bf16.msra.mxu0 %v1201_v60 }
  0x42   : > { %852 = vmatpush.bf16.msra.mxu1 %v1209_v61 }
  0x43   : > { %866 = vmatpush.bf16.msra.mxu2 %v1217_v62 }
  0x44   : > { %292 = vrot.lane.b32.xlu1 %v275_v7, %s1432_s21  ;;  %290 = vrot.lane.b32.xlu0 %v268_v8, %s1432_s21  ;;  %v341_v7 = vrot.slane %v339_v58, 1  ;;  %v1216_v8 = vld [vmem:[#allocation2 + $0x80] sm:$0xff] }
  0x45   : > { %880 = vmatpush.bf16.msra.mxu3 %v1225_v63  ;;  %839 = vmatpush.bf16.msra.mxu0 %v1200_v1 }
  0x46   : > { %294 = vrot.lane.b32.xlu2 %v282_v14, %s1432_s21  ;;  %v332_v14 = vshll.u32 %v1554_v23, 16  ;;  %853 = vmatpush.bf16.msra.mxu1 %v1208_v3  ;;  %v342_v21 = vor.u32 %v341_v7, %v337_v4  ;;  %v299_v23 = vrot.slane %v1580_v49, 1  ;;  %v344_v49 = vshrl.u32 %v1556_v26, 16 }
  0x47   : > { %867 = vmatpush.bf16.msra.mxu2 %v1216_v8 }
  0x48   : > { %v334_v22 = vrot.slane %v332_v14, 1 }
  0x49   : > { %881 = vmatpush.bf16.msra.mxu3 %v1224_v9  ;;  %892 = vmatpush.bf16.msrb.mxu0 %v1235_v24  ;;  %v609_v24 = vld.sshfl [vmem:[#allocation1 + $0x20] sm:$0xff pattern:$0x73625140] }
  0x4a   : > { %v335_v33 = vor.u32 %v334_v22, %v330_v12 }
  0x4c   : > { %296 = vrot.lane.b32.xlu0 %v289_v17, %s1432_s21  ;;  %v300_v17 = vrot.slane %v1588_v54, 1  ;;  %v346_v54 = vshll.u32 %v1556_v26, 16 }
  0x4d   : > { %893 = vmatpush.bf16.msrb.mxu0 %v1234_v30 }
  0x4e   : > { %v348_v47 = vrot.slane %v346_v54, 1 }
  0x50   : > { %v349_v58 = vor.u32 %v348_v47, %v344_v49 }
  0x51   : > { %894 = vmatpush.bf16.msrb.mxu0 %v1233_v46  ;;  %v1314_v46 = vld [vmem:[%s1729_s3] ss:$0 sm:$0xff] }
  0x80   : > { %v1608_v18 = vpop.permute.xlu2 %354 }
  0x81   : > { %v441_v42 = vsel %vm414_vm0, %v328_v27, %v1608_v18 }
  0x82   : > { %v476_v26 = vrot.slane %v441_v42, 4 }
  0x88   : > { %v1610_v28 = vpop.permute.xlu2 %356 }
  0x89   : > { %v444_v18 = vsel %vm414_vm0, %v335_v33, %v1610_v28 }
  0x8a   : > { %v479_v60 = vrot.slane %v444_v18, 4 }
  0x90   : > { %v1614_v43 = vpop.permute.xlu2 %402 }
  0x91   : > { %v453_v50 = vsel %vm414_vm0, %v1528_v5, %v1614_v43 }
  0x92   : > { %v477_v43 = vrot.slane %v453_v50, 2 }
  0x94   : > { %v493_v1 = vsel %vm490_vm1, %v476_v26, %v477_v43 }
  0x96   : > { %v319_v36 = vpop.permute.xlu1 %318  ;;  %v1612_v38 = vpop.permute.xlu0 %314 }
  0x97   : > { %v435_v25 = vsel %vm414_vm0, %v300_v17, %v319_v36  ;;  %v429_v55 = vsel %vm414_vm0, %v298_v35, %v1612_v38 }
  0x98   : > { %v1621_v59 = vpop.permute.xlu2 %408  ;;  %v481_v34 = vrot.slane %v435_v25, 6  ;;  %v475_v61 = vrot.slane %v429_v55, 6 }
  0x99   : > { %v462_v8 = vsel %vm414_vm0, %v1540_v11, %v1621_v59 }
  0x9a   : > { %v486_v14 = vrot.slane %v462_v8, 2 }
  0x9e   : > { %v1616_v48 = vpop.permute.xlu1 %320  ;;  %v1618_v52 = vpop.permute.xlu0 %316 }
  0x9f   : > { %v432_v56 = vsel %vm414_vm0, %v299_v23, %v1618_v52  ;;  %v438_v9 = vsel %vm414_vm0, %v301_v0, %v1616_v48 }
  0xa0   : > { %v295_v29 = vpop.permute.xlu2 %294  ;;  %v478_v62 = vrot.slane %v432_v56, 6  ;;  %v484_v17 = vrot.slane %v438_v9, 6 }
  0xa1   : > { %v423_v36 = vsel %vm414_vm0, %v1572_v37, %v295_v29 }
  0xa6   : > { %v1626_v15 = vpop.permute.xlu1 %360  ;;  %v359_v16 = vpop.permute.xlu0 %358 }
  0xa7   : > { %v447_v13 = vsel %vm414_vm0, %v342_v21, %v359_v16  ;;  %v450_v2 = vsel %vm414_vm0, %v349_v58, %v1626_v15 }
  0xa8   : > { %v482_v44 = vrot.slane %v447_v13, 4  ;;  %v485_v16 = vrot.slane %v450_v2, 4 }
  0xaa   : > { %v512_v11 = vsel %vm490_vm1, %v485_v16, %v486_v14 }
  0xae   : > { %v407_v39 = vpop.permute.xlu1 %406  ;;  %v405_v40 = vpop.permute.xlu0 %404 }
  0xaf   : > { %v459_v41 = vsel %vm414_vm0, %v1531_v6, %v407_v39  ;;  %v456_v37 = vsel %vm414_vm0, %v1537_v10, %v405_v40  ;;  %v503_v6 = vsel %vm487_vm2, %v423_v36, %v481_v34  ;;  %v1232_v10 = vld [vmem:[#allocation2 + $0x100] sm:$0xff] }
  0xb0   : > { %v483_v45 = vrot.slane %v459_v41, 2  ;;  %v480_v57 = vrot.slane %v456_v37, 2  ;;  %895 = vmatpush.bf16.msrb.mxu0 %v1232_v10  ;;  %v1313_v41 = vld [vmem:[%s1728_s2] ss:$0 sm:$0xff] }
  0xb2   : > { %v506_v53 = vsel %vm490_vm1, %v482_v44, %v483_v45  ;;  %v500_v3 = vsel %vm490_vm1, %v479_v60, %v480_v57 }
  0xb3   : > { %v507_v5 = vsel %vm494_vm3, %v503_v6, %v506_v53 }
  0xb4   : > { %590 = vst [vmem:[#allocation1 + $0x2] ss:$4 sm:$0xff] %v507_v5 }
  0xb6   : > { %v293_v63 = vpop.permute.xlu1 %292  ;;  %v291_v28 = vpop.permute.xlu0 %290 }
  0xb7   : > { %v420_v38 = vsel %vm414_vm0, %v1564_v31, %v293_v63  ;;  %v417_v52 = vsel %vm414_vm0, %v1567_v32, %v291_v28 }
  0xb8   : > { %v497_v4 = vsel %vm487_vm2, %v420_v38, %v478_v62  ;;  %v489_v7 = vsel %vm487_vm2, %v417_v52, %v475_v61 }
  0xb9   : > { %v501_v31 = vsel %vm494_vm3, %v497_v4, %v500_v3  ;;  %v495_v32 = vsel %vm494_vm3, %v489_v7, %v493_v1 }
  0xba   : > { %588 = vst [vmem:[#allocation1 + $0x1] ss:$4 sm:$0xff] %v501_v31 }
  0xbb   : > { %586 = vst [vmem:[#allocation1] ss:$4 sm:$0xff] %v495_v32 }
  0xbe   : > { %v297_v19 = vpop.permute.xlu0 %296 }
  0xbf   : > { %v426_v20 = vsel %vm414_vm0, %v1585_v51, %v297_v19 }
  0xc0   : > { %v509_v59 = vsel %vm487_vm2, %v426_v20, %v484_v17 }
  0xc1   : > { %v513_v15 = vsel %vm494_vm3, %v509_v59, %v512_v11 }
  0xc2   : > { %592 = vst [vmem:[#allocation1 + $0x3] ss:$4 sm:$0xff] %v513_v15 }
  0xc9   : > { %v605_v21 = vld.sshfl [vmem:[#allocation1] sm:$0xff pattern:$0x73625140]  ;;  %v606_v12 = vld.sshfl [vmem:[#allocation1 + $0x8] sm:$0xff pattern:$0x73625140] }
  0xca   : > { %840 = vmatmul.bf16.vlgmr.msra.gmra.mxu0 %v605_v21  ;;  %854 = vmatmul.bf16.vlgmr.msra.gmra.mxu1 %v606_v12  ;;  %v607_v48 = vld.sshfl [vmem:[#allocation1 + $0x10] sm:$0xff pattern:$0x73625140]  ;;  %v608_v22 = vld.sshfl [vmem:[#allocation1 + $0x18] sm:$0xff pattern:$0x73625140] }
  0xcb   : > { %868 = vmatmul.bf16.vlgmr.msra.gmra.mxu2 %v607_v48  ;;  %882 = vmatmul.bf16.vlgmr.msra.gmra.mxu3 %v608_v22 }
  0xda   : > { %1194 = vmatmul.msk.bf16.vlgmr.msrb.gmra.mxu0 %vm414_vm0, %v609_v24 }
 0x147   : > { %v841_v51 = vpop.f32.mrf.mxu0  ;;  %v855_v25 = vpop.f32.mrf.mxu1 }
 0x148   : > { %v856_v30 = vadd.f32 %v855_v25, %v841_v51 }
 0x14e   : > { %v869_v27 = vpop.f32.mrf.mxu2  ;;  %v883_v54 = vpop.f32.mrf.mxu3 }
 0x14f   : > { %v843_v29 = vpop.f32.mrf.mxu0  ;;  %v870_v13 = vadd.f32 %v869_v27, %v856_v30  ;;  %v857_v33 = vpop.f32.mrf.mxu1 }
 0x150   : > { %v858_v40 = vadd.f32 %v857_v33, %v843_v29 }
 0x151   : > { %v884_v39 = vadd.f32 %v883_v54, %v870_v13 }
 0x156   : > { %v871_v34 = vpop.f32.mrf.mxu2  ;;  %v885_v42 = vpop.f32.mrf.mxu3 }
 0x157   : > { %v897_v35 = vpop.f32.mrf.mxu0  ;;  %v872_v23 = vadd.f32 %v871_v34, %v858_v40 }
 0x158   : > { %v898_v36 = vadd.f32 %v897_v35, %v884_v39 }
 0x159   : > { %v886_v44 = vadd.f32 %v885_v42, %v872_v23 }
 0x15a   : > { %v906_v45 = vmul.f32 %v1313_v41, %v898_v36 }
 0x15c   : > { %v912_v47 = vadd.f32 %v1314_v46, %v906_v45 }
 0x15e   : > { %v914_v53 = vmax.f32 %v912_v47, 0.0 }
 0x15f   : > { %v899_v50 = vpop.f32.mrf.mxu0 }
 0x160   : > { %v900_v49 = vadd.f32 %v899_v50, %v886_v44 }
 0x162   : > { %v907_v37 = vmul.f32 %v1313_v41, %v900_v49 }
 0x164   : > { %v913_v6 = vadd.f32 %v1314_v46, %v907_v37 }
 0x166   : > { %v915_v18 = vmax.f32 %v913_v6, 0.0 }
 0x168   : > { %v1240_v55 = vpack.c.bf16 %v915_v18, %v914_v53 }
 0x16a   : > { %1241 = vst [vmem:[%s221_s10] sm:$0xff] %v1240_v55  }
 0x16b   : > { %1372 = shalt.err (!%p1369_p9)
}
 0x16c   : > { %s1433_s26 = smov 4  }
 0x16d   : > { %1247 = dma.vmem_to_hbm [thread:$0]  (%p1499_p4), %s936_s11, 128, %s938_s12, %s921_s13, %s1432_s21, %s1432_s21, %s1433_s26  }
 0x16e PF: > { %p1259_p10 = scmp.ge.s32.totalorder %s1427_s20, 2  ;;  %s952_s6 = sand.u32 1, %s1407_s15  }
 0x16f   : > { %s953_s7 = scalar_lea.sflag [#allocation4], %s952_s6 }
 0x170   : > { %p1254_p11 = pnand %p1259_p10, %p1506_p8 }
 0x172   : > { %p1255_p12 = pneg %p1254_p11 }
 0x174   : > { %1402 = dma.done.wait (%p1255_p12), %s953_s7, 128  }
 0x175   : > { %1404 = vsyncadd (%p1255_p12), %s953_s7, 4294967168  ;;  %s18_s20 = sadd.s32 1, %s1427_s20   ;;  %s1733_s15 = smov %s1411_s16 }
 0x176   : > { %p15_p13 = scmp.ge.s32.totalorder %s18_s20, 4   ;;  %s1734_s16 = smov %s1415_s17 }
 0x177   : > { %s1735_s17 = smov %s1512_s28  ;;  %s1736_s18 = smov %s1423_s19 }
 0x178   : > { %s1737_s19 = smov %s1739_s23  ;;  %17 = sbr.rel (!%p15_p13) target bundleno = 5 (0x5), region = 86 }
 0x17d   :  { %959 = vsyncpa [#allocation3], 1 }
 0x17e   :  { %961 = vsyncpa [#allocation3 + $0x1], 1 }
 0x17f   :  { %962 = vsyncpa [#allocation4], 1 }
 0x180   :  { %964 = vsyncpa [#allocation4 + $0x1], 1 }

</bundles_post_ra>
